<compile_context>
chip_gen: v7x
topology: tpu7x:2x2x1
jax: 0.10.0
libtpu: 0.0.40
codegen_flags: <defaults>
</compile_context>

<pallas_src>
import functools

import jax
import jax.numpy as jnp
from jax.experimental import pallas as pl
from jax.experimental.pallas import tpu as pltpu

_LANE = 128


def _round_up(x, m):
    return ((x + m - 1) // m) * m


def dqn_kernel(x_ref, w1_ref, b1_ref, w2_ref, b2_ref, w3_ref, b3_ref, o_ref):
    # x tile: (TB, S) f32 -> bf16 for the MXU. Weights arrive already bf16.
    x = x_ref[...].astype(jnp.bfloat16)

    # fc1 + ReLU  (bf16 operands, f32 accumulation, f32 elementwise)
    h1 = jnp.dot(x, w1_ref[...], preferred_element_type=jnp.float32)
    h1 = jnp.maximum(h1 + b1_ref[...], 0.0)

    # dropout (eval mode) == identity

    # fc2 + ReLU
    h2 = jnp.dot(h1.astype(jnp.bfloat16), w2_ref[...],
                 preferred_element_type=jnp.float32)
    h2 = jnp.maximum(h2 + b2_ref[...], 0.0)

    # dropout (eval mode) == identity

    # fc3 (no activation); lane-dense padded output, stored as bf16 to halve
    # the HBM writeback stream.
    out = jnp.dot(h2.astype(jnp.bfloat16), w3_ref[...],
                  preferred_element_type=jnp.float32)
    o_ref[...] = (out + b3_ref[...]).astype(o_ref.dtype)


def prepare_params(params):
    """One-time weight prep (hoisted out of the forward path).

    Casts weights to bf16 and zero-pads:
      * hidden dim 64 -> 128 so intermediates are full-lane vregs,
      * action dim   -> multiple of 128 for a lane-dense output store.
    Padding is exact: padded hidden channels see zero weights + zero bias, so
    ReLU keeps them at 0, and padded w2/w3 rows multiply those zeros.
    """
    S, H = params["w1"].shape
    A = params["w3"].shape[1]
    H_pad = _round_up(max(H, _LANE), _LANE)
    A_pad = _round_up(max(A, _LANE), _LANE)

    w1 = jnp.zeros((S, H_pad), jnp.bfloat16).at[:, :H].set(
        params["w1"].astype(jnp.bfloat16))
    b1 = jnp.zeros((1, H_pad), jnp.float32).at[:, :H].set(
        params["b1"].astype(jnp.float32))
    w2 = jnp.zeros((H_pad, H_pad), jnp.bfloat16).at[:H, :H].set(
        params["w2"].astype(jnp.bfloat16))
    b2 = jnp.zeros((1, H_pad), jnp.float32).at[:, :H].set(
        params["b2"].astype(jnp.float32))
    w3 = jnp.zeros((H_pad, A_pad), jnp.bfloat16).at[:H, :A].set(
        params["w3"].astype(jnp.bfloat16))
    b3 = jnp.zeros((1, A_pad), jnp.float32).at[:, :A].set(
        params["b3"].astype(jnp.float32))

    return {"w1": w1, "b1": b1, "w2": w2, "b2": b2, "w3": w3, "b3": b3,
            "action_size": int(A)}


@functools.partial(jax.jit, static_argnames=("action_size",))
def _dqn_forward_prepared(x, w1, b1, w2, b2, w3, b3, *, action_size):
    B, S = x.shape
    H_pad = w1.shape[1]
    A_pad = w3.shape[1]
    A = action_size

    # Batch tiling: big tiles amortize the ~0.35us/step overhead.  Once the
    # batch is large, clamp the tile so the grid has >=2 steps and the
    # "parallel" batch axis can be split across v7x's two TensorCores.
    if B >= 64:
        TB = min(1024, _round_up((B + 1) // 2, 16))
    else:
        TB = _round_up(B, 16)
    B_pad = _round_up(B, TB)
    if B_pad != B:
        # Padded rows are zeros; rows are independent and sliced away below.
        x = jnp.zeros((B_pad, S), x.dtype).at[:B, :].set(x)
    grid = (B_pad // TB,)

    x_spec = pl.BlockSpec((TB, S), lambda i: (i, 0))
    out_spec = pl.BlockSpec((TB, A_pad), lambda i: (i, 0))
    # Weights/biases: same block for every grid step -> VMEM-resident.
    resident = lambda arr: pl.BlockSpec(arr.shape, lambda i: (0,) * arr.ndim)

    flops = 2 * B_pad * (S * H_pad + H_pad * H_pad + H_pad * A_pad)
    bytes_accessed = (
        x.size * x.dtype.itemsize
        + w1.size * 2 + w2.size * 2 + w3.size * 2
        + b1.size * 4 + b2.size * 4 + b3.size * 4
        + B_pad * A_pad * 2  # bf16 output
    )

    out = pl.pallas_call(
        dqn_kernel,
        out_shape=jax.ShapeDtypeStruct((B_pad, A_pad), jnp.bfloat16),
        grid=grid,
        in_specs=[x_spec, resident(w1), resident(b1), resident(w2),
                  resident(b2), resident(w3), resident(b3)],
        out_specs=out_spec,
        compiler_params=pltpu.CompilerParams(
            dimension_semantics=("parallel",),
            vmem_limit_bytes=32 * 1024 * 1024,
        ),
        cost_estimate=pl.CostEstimate(
            flops=flops, transcendentals=0, bytes_accessed=bytes_accessed),
    )(x, w1, b1, w2, b2, w3, b3)

    # Slice back to the real batch / action columns, upcast tiny result to f32.
    return out[:B, :A].astype(jnp.float32)


def dqn_forward(x, prep):
    """x: [B, state_size] f32. prep: output of prepare_params()."""
    return _dqn_forward_prepared(
        x, prep["w1"], prep["b1"], prep["w2"], prep["b2"], prep["w3"],
        prep["b3"], action_size=prep["action_size"])


def init_params(key, state_size, action_size, hidden_size=64):
    """Deterministic init. Weights stored as [in, out] (transposed vs PyTorch)."""
    ks = jax.random.split(key, 6)

    def linear(kw, kb, fan_in, fan_out):
        # PyTorch nn.Linear default: U(-1/sqrt(fan_in), 1/sqrt(fan_in))
        bound = 1.0 / jnp.sqrt(jnp.float32(fan_in))
        w = jax.random.uniform(kw, (fan_in, fan_out), jnp.float32, -bound, bound)
        b = jax.random.uniform(kb, (1, fan_out), jnp.float32, -bound, bound)
        return w, b

    w1, b1 = linear(ks[0], ks[1], state_size, hidden_size)
    w2, b2 = linear(ks[2], ks[3], hidden_size, hidden_size)
    w3, b3 = linear(ks[4], ks[5], hidden_size, action_size)
    return {"w1": w1, "b1": b1, "w2": w2, "b2": b2, "w3": w3, "b3": b3}


def reference_forward_bf16(x, params):
    """Matches the kernel's numerics: bf16 matmul operands, f32 accumulation."""
    def mm(a, w):
        return jnp.dot(a.astype(jnp.bfloat16), w.astype(jnp.bfloat16),
                       preferred_element_type=jnp.float32)
    h1 = jnp.maximum(mm(x, params["w1"]) + params["b1"], 0.0)
    h2 = jnp.maximum(mm(h1, params["w2"]) + params["b2"], 0.0)
    return mm(h2, params["w3"]) + params["b3"]


def reference_forward_f32(x, params):
    h1 = jnp.maximum(x @ params["w1"] + params["b1"], 0.0)
    h2 = jnp.maximum(h1 @ params["w2"] + params["b2"], 0.0)
    return h2 @ params["w3"] + params["b3"]


if __name__ == "__main__":
    state_size, action_size, hidden_size = 16, 8, 64
    batch = 8

    key = jax.random.PRNGKey(0)
    k_params, k_x = jax.random.split(key)

    params = init_params(k_params, state_size, action_size, hidden_size)
    prep = prepare_params(params)  # one-time; hoisted out of the forward path
    x = jax.random.normal(k_x, (batch, state_size), jnp.float32)

    out = dqn_forward(x, prep)
    out = jax.block_until_ready(out)
    assert out.shape == (batch, action_size)

    # Tight check vs a reference with matching bf16-operand numerics
    # (kernel additionally rounds the output to bf16, well inside tolerance).
    ref_bf16 = reference_forward_bf16(x, params)
    assert jnp.allclose(out, ref_bf16, atol=1e-2, rtol=1e-2), \
        "mismatch vs bf16-operand reference"

    # Looser sanity check vs the full-f32 reference (bf16 operand rounding).
    ref_f32 = reference_forward_f32(x, params)
    assert jnp.allclose(out, ref_f32, atol=5e-2, rtol=5e-2), \
        "mismatch vs f32 reference"

    print("KERNEL_OK")
</pallas_src>

<mosaic_0001>
module attributes {stable_mosaic.version = 11 : i64} {
  func.func @dqn_kernel(%arg0: i32, %arg1: memref<16x16xf32, #tpu.memory_space<vmem>>, %arg2: memref<16x128xbf16, #tpu.memory_space<vmem>>, %arg3: memref<1x128xf32, #tpu.memory_space<vmem>>, %arg4: memref<128x128xbf16, #tpu.memory_space<vmem>>, %arg5: memref<1x128xf32, #tpu.memory_space<vmem>>, %arg6: memref<128x128xbf16, #tpu.memory_space<vmem>>, %arg7: memref<1x128xf32, #tpu.memory_space<vmem>>, %arg8: memref<16x128xbf16, #tpu.memory_space<vmem>>) attributes {dimension_semantics = [#tpu.dimension_semantics<parallel>], iteration_bounds = array<i64: 1>, scalar_prefetch = 0 : i64, scratch_operands = 0 : i64, tpu.core_type = #tpu.core_type<tc>, window_params = [{transform_indices = @transform_0, window_bounds = array<i64: 16, 16>}, {pipeline_mode = #tpu.pipeline_mode<synchronous>, transform_indices = @transform_1, window_bounds = array<i64: 16, 128>}, {pipeline_mode = #tpu.pipeline_mode<synchronous>, transform_indices = @transform_2, window_bounds = array<i64: 1, 128>}, {pipeline_mode = #tpu.pipeline_mode<synchronous>, transform_indices = @transform_3, window_bounds = array<i64: 128, 128>}, {pipeline_mode = #tpu.pipeline_mode<synchronous>, transform_indices = @transform_4, window_bounds = array<i64: 1, 128>}, {pipeline_mode = #tpu.pipeline_mode<synchronous>, transform_indices = @transform_5, window_bounds = array<i64: 128, 128>}, {pipeline_mode = #tpu.pipeline_mode<synchronous>, transform_indices = @transform_6, window_bounds = array<i64: 1, 128>}, {transform_indices = @transform_7, window_bounds = array<i64: 16, 128>}]} {
    %c0 = arith.constant 0 : index
    %c0_0 = arith.constant 0 : index
    %0 = vector.load %arg1[%c0, %c0_0] : memref<16x16xf32, #tpu.memory_space<vmem>>, vector<16x16xf32>
    %1 = arith.truncf %0 : vector<16x16xf32> to vector<16x16xbf16>
    %c0_1 = arith.constant 0 : index
    %c0_2 = arith.constant 0 : index
    %2 = vector.load %arg2[%c0_1, %c0_2] : memref<16x128xbf16, #tpu.memory_space<vmem>>, vector<16x128xbf16>
    %cst = arith.constant dense<0.000000e+00> : vector<16x128xf32>
    %3 = tpu.matmul %1, %2, %cst {dimension_numbers = #tpu.dot_dimension_numbers<[1], [0], [0], [1], [0, 0, 1, 1], [], []>} : vector<16x16xbf16>, vector<16x128xbf16>, vector<16x128xf32> -> vector<16x128xf32>
    %c0_3 = arith.constant 0 : index
    %c0_4 = arith.constant 0 : index
    %4 = vector.load %arg3[%c0_3, %c0_4] : memref<1x128xf32, #tpu.memory_space<vmem>>, vector<1x128xf32>
    %5 = vector.broadcast %4 : vector<1x128xf32> to vector<16x128xf32>
    %6 = arith.addf %3, %5 : vector<16x128xf32>
    %cst_5 = arith.constant 0.000000e+00 : f32
    %7 = vector.broadcast %cst_5 : f32 to vector<16x128xf32>
    %8 = arith.maximumf %6, %7 : vector<16x128xf32>
    %9 = arith.truncf %8 : vector<16x128xf32> to vector<16x128xbf16>
    %c0_6 = arith.constant 0 : index
    %c0_7 = arith.constant 0 : index
    %10 = vector.load %arg4[%c0_6, %c0_7] : memref<128x128xbf16, #tpu.memory_space<vmem>>, vector<128x128xbf16>
    %cst_8 = arith.constant dense<0.000000e+00> : vector<16x128xf32>
    %11 = tpu.matmul %9, %10, %cst_8 {dimension_numbers = #tpu.dot_dimension_numbers<[1], [0], [0], [1], [0, 0, 1, 1], [], []>} : vector<16x128xbf16>, vector<128x128xbf16>, vector<16x128xf32> -> vector<16x128xf32>
    %c0_9 = arith.constant 0 : index
    %c0_10 = arith.constant 0 : index
    %12 = vector.load %arg5[%c0_9, %c0_10] : memref<1x128xf32, #tpu.memory_space<vmem>>, vector<1x128xf32>
    %13 = vector.broadcast %12 : vector<1x128xf32> to vector<16x128xf32>
    %14 = arith.addf %11, %13 : vector<16x128xf32>
    %cst_11 = arith.constant 0.000000e+00 : f32
    %15 = vector.broadcast %cst_11 : f32 to vector<16x128xf32>
    %16 = arith.maximumf %14, %15 : vector<16x128xf32>
    %17 = arith.truncf %16 : vector<16x128xf32> to vector<16x128xbf16>
    %c0_12 = arith.constant 0 : index
    %c0_13 = arith.constant 0 : index
    %18 = vector.load %arg6[%c0_12, %c0_13] : memref<128x128xbf16, #tpu.memory_space<vmem>>, vector<128x128xbf16>
    %cst_14 = arith.constant dense<0.000000e+00> : vector<16x128xf32>
    %19 = tpu.matmul %17, %18, %cst_14 {dimension_numbers = #tpu.dot_dimension_numbers<[1], [0], [0], [1], [0, 0, 1, 1], [], []>} : vector<16x128xbf16>, vector<128x128xbf16>, vector<16x128xf32> -> vector<16x128xf32>
    %c0_15 = arith.constant 0 : index
    %c0_16 = arith.constant 0 : index
    %20 = vector.load %arg7[%c0_15, %c0_16] : memref<1x128xf32, #tpu.memory_space<vmem>>, vector<1x128xf32>
    %21 = vector.broadcast %20 : vector<1x128xf32> to vector<16x128xf32>
    %22 = arith.addf %19, %21 : vector<16x128xf32>
    %23 = arith.truncf %22 : vector<16x128xf32> to vector<16x128xbf16>
    %c0_17 = arith.constant 0 : index
    %c0_18 = arith.constant 0 : index
    %24 = vector.load %arg8[%c0_17, %c0_18] : memref<16x128xbf16, #tpu.memory_space<vmem>>, vector<16x128xbf16>
    tpu.vector_store %arg8[%c0_17, %c0_18], %23 {strides = array<i32>} : memref<16x128xbf16, #tpu.memory_space<vmem>>, vector<16x128xbf16>,
    return
  }
  func.func @transform_0(%arg0: i32) -> (i32, i32) {
    %c0_i32 = arith.constant 0 : i32
    %c0_i32_0 = arith.constant 0 : i32
    return %arg0, %c0_i32 : i32, i32
  }
  func.func @transform_1(%arg0: i32) -> (i32, i32) {
    %c0_i32 = arith.constant 0 : i32
    %c0_i32_0 = arith.constant 0 : i32
    %c0_i32_1 = arith.constant 0 : i32
    return %c0_i32, %c0_i32_0 : i32, i32
  }
  func.func @transform_2(%arg0: i32) -> (i32, i32) {
    %c0_i32 = arith.constant 0 : i32
    %c0_i32_0 = arith.constant 0 : i32
    %c0_i32_1 = arith.constant 0 : i32
    return %c0_i32, %c0_i32_0 : i32, i32
  }
  func.func @transform_3(%arg0: i32) -> (i32, i32) {
    %c0_i32 = arith.constant 0 : i32
    %c0_i32_0 = arith.constant 0 : i32
    %c0_i32_1 = arith.constant 0 : i32
    return %c0_i32, %c0_i32_0 : i32, i32
  }
  func.func @transform_4(%arg0: i32) -> (i32, i32) {
    %c0_i32 = arith.constant 0 : i32
    %c0_i32_0 = arith.constant 0 : i32
    %c0_i32_1 = arith.constant 0 : i32
    return %c0_i32, %c0_i32_0 : i32, i32
  }
  func.func @transform_5(%arg0: i32) -> (i32, i32) {
    %c0_i32 = arith.constant 0 : i32
    %c0_i32_0 = arith.constant 0 : i32
    %c0_i32_1 = arith.constant 0 : i32
    return %c0_i32, %c0_i32_0 : i32, i32
  }
  func.func @transform_6(%arg0: i32) -> (i32, i32) {
    %c0_i32 = arith.constant 0 : i32
    %c0_i32_0 = arith.constant 0 : i32
    %c0_i32_1 = arith.constant 0 : i32
    return %c0_i32, %c0_i32_0 : i32, i32
  }
  func.func @transform_7(%arg0: i32) -> (i32, i32) {
    %c0_i32 = arith.constant 0 : i32
    %c0_i32_0 = arith.constant 0 : i32
    return %arg0, %c0_i32 : i32, i32
  }
}

</mosaic_0001>

<bundles_post_ra>
// kernel: _dqn_forward_prepared.1
= control target key start
LH: loop header
LB: loop body
LE: loop exit
PB: predicated region body
PF: predicated region fallthrough
CT: control target
= control target key end

     0   :  { %12 = vsyncpa [#allocation3], 0  ;;  %s645_s0 = inlined_call_operand.vmem [shape: f32[16,16], index: 0, kind: input, shape index: {}]   ;;  %s646_s1 = inlined_call_operand.vmem [shape: bf16[16,128], index: 1, kind: input, shape index: {}]   ;;  %s647_s2 = inlined_call_operand.vmem [shape: f32[1,128], index: 2, kind: input, shape index: {}]   ;;  %s648_s3 = inlined_call_operand.hbm [shape: bf16[128,128], index: 3, kind: input, shape index: {}]   ;;  %s649_s4 = inlined_call_operand.vmem [shape: f32[1,128], index: 4, kind: input, shape index: {}]   ;;  %s650_s5 = inlined_call_operand.hbm [shape: bf16[128,128], index: 5, kind: input, shape index: {}]   ;;  %s651_s6 = inlined_call_operand.vmem [shape: f32[1,128], index: 6, kind: input, shape index: {}]   ;;  %s652_s7 = inlined_call_operand.vmem [shape: bf16[16,128], index: 7, kind: output, shape index: {}]  }
   0x1   :  { %13 = vsyncpa [#allocation5], 0  ;;  %s531_s24 = smov [#allocation2]   ;;  %s483_s28 = scalar_lea.hbm %s648_s3, 1024 }
   0x2   :  { %s25_s25 = sshll.u32 %s531_s24, 4  ;;  %p484_p0 = scmp.ne.s32.totalorder %s648_s3, %s483_s28  ;;  %s26_s25 = int_to_ptr.vmem [resolvable:$true] %s25_s25 }
   0x3   :  { %p487_p1 = scmp.lt.u32.totalorder %s483_s28, %s648_s3 }
   0x5   :  { %p489_p2 = pnand %p487_p1, %p484_p0 }
   0x7   :  { %492 = shalt.err (!%p489_p2)
}
   0x8   :  { %s493_s10 = scalar_lea.vmem %s26_s25, 1024  ;;  %p498_p4 = scmp.lt.s32.totalorder %s26_s25, %s26_s25 }
   0x9   :  { %p494_p3 = scmp.ne.s32.totalorder %s26_s25, %s493_s10  ;;  %p499_p5 = scmp.lt.s32.totalorder %s493_s10, %s493_s10 }
   0xb   :  { %p500_p6 = por %p499_p5, %p498_p4 }
   0xd   :  { %p501_p7 = pnand %p500_p6, %p494_p3 }
   0xf   :  { %504 = shalt.err (!%p501_p7)
}
  0x10   :  { %s532_s11 = smov 64   ;;  %s533_s12 = smov 4  }
  0x11   :  { %31 = dma.hbm_to_vmem [thread:$0]  %s648_s3, 1024, %s26_s25, [#allocation3], %s532_s11, %s532_s11, %s533_s12  }
  0x12   :  { %s534_s15 = smov [#allocation4]   ;;  %s505_s19 = scalar_lea.hbm %s650_s5, 1024 }
  0x13   :  { %s39_s16 = sshll.u32 %s534_s15, 4  ;;  %p506_p8 = scmp.ne.s32.totalorder %s650_s5, %s505_s19  ;;  %s40_s16 = int_to_ptr.vmem [resolvable:$true] %s39_s16 }
  0x14   :  { %p509_p9 = scmp.lt.u32.totalorder %s505_s19, %s650_s5 }
  0x16   :  { %p511_p10 = pnand %p509_p9, %p506_p8 }
  0x18   :  { %514 = shalt.err (!%p511_p10)
}
  0x19   :  { %s515_s24 = scalar_lea.vmem %s40_s16, 1024  ;;  %p520_p12 = scmp.lt.s32.totalorder %s40_s16, %s40_s16 }
  0x1a   :  { %p516_p11 = scmp.ne.s32.totalorder %s40_s16, %s515_s24  ;;  %p521_p13 = scmp.lt.s32.totalorder %s515_s24, %s515_s24 }
  0x1c   :  { %p522_p0 = por %p521_p13, %p520_p12 }
  0x1e   :  { %p523_p1 = pnand %p522_p0, %p516_p11 }
  0x20   :  { %526 = shalt.err (!%p523_p1)
}
  0x21   :  { %45 = dma.hbm_to_vmem [thread:$0]  %s650_s5, 1024, %s40_s16, [#allocation5], %s532_s11, %s532_s11, %s533_s12  }
  0x22   :  { %527 = dma.done.wait [#allocation3], 1024  }
  0x23   :  { %528 = vsyncadd [#allocation3], 4294966272 }
  0x24   :  { %529 = dma.done.wait [#allocation5], 1024  }
  0x25   :  { %530 = vsyncadd [#allocation5], 4294966272  ;;  %v535_v0 = vmov 0.0   ;;  %vm536_vm0 = vmmov 0   ;;  %v466_v1 = vld [vmem:[%s646_s1] sm:$0xff]   ;;  %v56_v3 = vld [vmem:[%s645_s0 + $0x8] sm:$0xff] }
  0x26   :  { %414 = vmatprep.subr.bf16.mxu0 %v535_v0  ;;  %416 = vmatprep.mubr.msk.bf16.mxu0 %vm536_vm0, %v535_v0  ;;  %v55_v2 = vld [vmem:[%s645_s0] sm:$0xff]  ;;  %vm73_vm1 = vcmask 130048   ;;  %v468_v6 = vld [vmem:[#allocation2 + $0x8] sm:$0xff]   ;;  %v469_v7 = vld [vmem:[#allocation2 + $0x10] sm:$0xff]  }
  0x27   :  { %420 = vmatprep.subr.bf16.mxu1 %v535_v0  ;;  %436 = vmatprep.mubr.msk.bf16.mxu1 %vm536_vm0, %v535_v0  ;;  %v57_v4 = vpack.c.bf16 %v56_v3, %v55_v2  ;;  %v467_v5 = vld [vmem:[#allocation2] sm:$0xff]   ;;  %v470_v8 = vld [vmem:[#allocation2 + $0x18] sm:$0xff]   ;;  %v472_v10 = vld [vmem:[#allocation2 + $0x28] sm:$0xff]  }
  0x28   :  { %415 = vmatpush3.bf16.msra.mxu0 %v466_v1  ;;  %421 = vmatpush3.bf16.msra.mxu1 %v467_v5  ;;  %v471_v9 = vld [vmem:[#allocation2 + $0x20] sm:$0xff]   ;;  %v473_v11 = vld [vmem:[#allocation2 + $0x30] sm:$0xff]   ;;  %v474_v12 = vld [vmem:[#allocation2 + $0x38] sm:$0xff]  }
  0x29   :  { %440 = vmatprep.subr.bf16.mxu0 %v535_v0  ;;  %422 = vmatprep.subr.bf16.mxu1 %v535_v0  ;;  %v475_v13 = vld [vmem:[#allocation4] sm:$0xff]   ;;  %v476_v14 = vld [vmem:[#allocation4 + $0x8] sm:$0xff]   ;;  %v477_v15 = vld [vmem:[#allocation4 + $0x10] sm:$0xff]  }
  0x2a   :  { %v478_v16 = vld [vmem:[#allocation4 + $0x18] sm:$0xff]   ;;  %v479_v17 = vld [vmem:[#allocation4 + $0x20] sm:$0xff]   ;;  %v480_v18 = vld [vmem:[#allocation4 + $0x28] sm:$0xff]  }
  0x2b   :  { %417 = vmatmul.mubr.msk.bf16.vlgmr.msra.gmra.mrb[0].mxu0 %vm73_vm1, %v57_v4  ;;  %v364_v19 = vld [vmem:[%s647_s2] ss:$0 sm:$0xff]  ;;  %v481_v29 = vld [vmem:[#allocation4 + $0x30] sm:$0xff]   ;;  %v482_v30 = vld [vmem:[#allocation4 + $0x38] sm:$0xff]  }
  0x2c   :  { %456 = vmatprep.mubr.msk.bf16.mxu0 %vm536_vm0, %v535_v0  ;;  %423 = vmatpush3.bf16.msra.mxu1 %v468_v6  ;;  %v367_v31 = vld [vmem:[%s649_s4] ss:$0 sm:$0xff] }
  0x2d   :  { %424 = vmatprep.subr.bf16.mxu1 %v535_v0  ;;  %441 = vmatpush3.bf16.msra.mxu0 %v475_v13  ;;  %v376_v41 = vld [vmem:[%s651_s6] ss:$0 sm:$0xff] }
  0x2e   :  { %442 = vmatprep.subr.bf16.mxu0 %v535_v0 }
  0x30   :  { %425 = vmatpush3.bf16.msra.mxu1 %v469_v7 }
  0x31   :  { %426 = vmatprep.subr.bf16.mxu1 %v535_v0  ;;  %443 = vmatpush3.bf16.msra.mxu0 %v476_v14 }
  0x32   :  { %444 = vmatprep.subr.bf16.mxu0 %v535_v0 }
  0x34   :  { %427 = vmatpush3.bf16.msra.mxu1 %v470_v8 }
  0x35   :  { %428 = vmatprep.subr.bf16.mxu1 %v535_v0  ;;  %445 = vmatpush3.bf16.msra.mxu0 %v477_v15 }
  0x36   :  { %446 = vmatprep.subr.bf16.mxu0 %v535_v0 }
  0x38   :  { %429 = vmatpush3.bf16.msra.mxu1 %v471_v9 }
  0x39   :  { %430 = vmatprep.subr.bf16.mxu1 %v535_v0  ;;  %447 = vmatpush3.bf16.msra.mxu0 %v478_v16 }
  0x3a   :  { %448 = vmatprep.subr.bf16.mxu0 %v535_v0 }
  0x3c   :  { %431 = vmatpush3.bf16.msra.mxu1 %v472_v10 }
  0x3d   :  { %432 = vmatprep.subr.bf16.mxu1 %v535_v0  ;;  %449 = vmatpush3.bf16.msra.mxu0 %v479_v17 }
  0x3e   :  { %450 = vmatprep.subr.bf16.mxu0 %v535_v0 }
  0x40   :  { %433 = vmatpush3.bf16.msra.mxu1 %v473_v11 }
  0x41   :  { %434 = vmatprep.subr.bf16.mxu1 %v535_v0  ;;  %451 = vmatpush3.bf16.msra.mxu0 %v480_v18 }
  0x42   :  { %452 = vmatprep.subr.bf16.mxu0 %v535_v0 }
  0x44   :  { %435 = vmatpush3.bf16.msra.mxu1 %v474_v12 }
  0x45   :  { %453 = vmatpush3.bf16.msra.mxu0 %v481_v29 }
  0x46   :  { %454 = vmatprep.subr.bf16.mxu0 %v535_v0 }
  0x49   :  { %455 = vmatpush3.bf16.msra.mxu0 %v482_v30 }
  0xfe   :  { %v111_v20 = vpop.f32.mrb[0].mxu0 }
  0xff   :  { %v112_v21 = vadd.f32 %v364_v19, %v111_v20  ;;  %v418_v22 = vpop.f32.mrb[1].mxu0 }
 0x100   :  { %v114_v23 = vpop.f32.mrb[2].mxu0 }
 0x101   :  { %v115_v24 = vadd.f32 %v364_v19, %v114_v23  ;;  %v419_v25 = vpop.f32.mrb[3].mxu0  ;;  %v118_v26 = vmax.f32 %v112_v21, 0.0 }
 0x103   :  { %v119_v27 = vmax.f32 %v115_v24, 0.0 }
 0x105   :  { %v120_v28 = vpack.c.bf16 %v119_v27, %v118_v26 }
 0x107   :  { %437 = vmatmul.mubr.bf16.vlgmr.msra.gmra.mrb[0].mxu1 %v120_v28 }
 0x1da   :  { %v226_v32 = vpop.f32.mrb[0].mxu1 }
 0x1db   :  { %v227_v33 = vadd.f32 %v367_v31, %v226_v32  ;;  %v438_v34 = vpop.f32.mrb[1].mxu1 }
 0x1dc   :  { %v229_v35 = vpop.f32.mrb[2].mxu1 }
 0x1dd   :  { %v230_v36 = vadd.f32 %v367_v31, %v229_v35  ;;  %v439_v37 = vpop.f32.mrb[3].mxu1  ;;  %v233_v38 = vmax.f32 %v227_v33, 0.0 }
 0x1df   :  { %v234_v39 = vmax.f32 %v230_v36, 0.0 }
 0x1e1   :  { %v235_v40 = vpack.c.bf16 %v234_v39, %v233_v38 }
 0x1e3   :  { %457 = vmatmul.mubr.bf16.vlgmr.msra.gmra.mrb[4].mxu0 %v235_v40 }
 0x2b6   :  { %v341_v42 = vpop.f32.mrb[4].mxu0 }
 0x2b7   :  { %v458_v43 = vpop.f32.mrb[5].mxu0  ;;  %v342_v45 = vadd.f32 %v376_v41, %v341_v42 }
 0x2b8   :  { %v344_v44 = vpop.f32.mrb[6].mxu0 }
 0x2b9   :  { %v345_v46 = vadd.f32 %v376_v41, %v344_v44  ;;  %v459_v47 = vpop.f32.mrb[7].mxu0 }
 0x2bb   :  { %v392_v48 = vpack.c.bf16 %v345_v46, %v342_v45 }
 0x2bd   :  { %393 = vst [vmem:[%s652_s7] sm:$0xff] %v392_v48  }
 0x2be   :  { %362 = vsyncpa [#allocation3], 1 }
 0x2bf   :  { %363 = vsyncpa [#allocation5], 1 }

</bundles_post_ra>
